<compile_context>
chip_gen: v6e
topology: v6e:2x2x1
jax: 0.10.0
libtpu: 0.0.40
codegen_flags: <defaults>
</compile_context>

<pallas_src>
import jax
import jax.numpy as jnp
from jax.experimental import pallas as pl
from jax.experimental.pallas import tpu as pltpu

_LANE = 128
_SUBLANE = 8
_MAX_LANE_WIDTH = 4096          # widest folded last dim we bother with
_TARGET_BLOCK_BYTES = 4 << 20   # ~4 MiB/buffer: 2 in-bufs + 2 out-bufs ~ 16 MiB
                                # live, fits scoped VMEM on v5e/v6e/v7x


def _copy_kernel(w_ref, o_ref):
    # Pure materialization of the learnable embedding (forward() == weight).
    o_ref[...] = w_ref[...]


def feature_grid_forward(weight: jax.Array, materialize: bool = False) -> jax.Array:
    """Pallas equivalent of FeatureGrid.forward(): returns the stored weight.

    Default (fast) path: forward() is the identity, so return the parameter
    directly -- zero HBM traffic, zero launch overhead.

    materialize=True: produce a fresh output buffer via a tiled Pallas copy
    with lane-dense folding and multi-MiB blocks (near HBM roofline).
    """
    if not materialize:
        return weight
    return _materialize_copy(weight)


def _fold_2d(total: int, itemsize: int):
    """Pick a lane-dense 2D folding (rows, cols) and a row-block size."""
    cols = _LANE
    rows = total // cols
    # Widen the lane axis while keeping rows a multiple of 8 and >= 16
    # (>= 2 blocks of 8 rows -> >= 2 grid steps so v7x can use both TCs).
    while (cols * 2 <= _MAX_LANE_WIDTH
           and total % (cols * 2) == 0
           and (total // (cols * 2)) % _SUBLANE == 0
           and (total // (cols * 2)) >= 2 * _SUBLANE):
        cols *= 2
        rows //= 2
    # Largest row-block that is a multiple of 8, divides rows exactly, keeps
    # >= 2 grid steps, and stays under the per-buffer byte target.
    max_rows_by_bytes = max(_SUBLANE, _TARGET_BLOCK_BYTES // (cols * itemsize))
    if rows >= 2 * _SUBLANE:
        block_rows = _SUBLANE
        cap = min(rows // 2, max_rows_by_bytes)
        cand = _SUBLANE
        while cand <= cap:
            if rows % cand == 0:
                block_rows = cand
            cand += _SUBLANE
    else:
        block_rows = rows
    return rows, cols, block_rows


def _materialize_copy(weight: jax.Array) -> jax.Array:
    orig_shape = weight.shape
    total = weight.size
    itemsize = jnp.dtype(weight.dtype).itemsize

    if total % (_SUBLANE * _LANE) != 0:
        # Odd total size: whole array as a single VMEM-resident block.
        return pl.pallas_call(
            _copy_kernel,
            out_shape=jax.ShapeDtypeStruct(orig_shape, weight.dtype),
        )(weight)

    rows, cols, block_rows = _fold_2d(total, itemsize)
    w2d = weight.reshape(rows, cols)  # layout plumbing in the wrapper (XLA)
    n_steps = rows // block_rows

    out2d = pl.pallas_call(
        _copy_kernel,
        out_shape=jax.ShapeDtypeStruct((rows, cols), weight.dtype),
        grid_spec=pltpu.PrefetchScalarGridSpec(
            num_scalar_prefetch=0,
            grid=(n_steps,),
            in_specs=[pl.BlockSpec((block_rows, cols), lambda i: (i, 0))],
            out_specs=pl.BlockSpec((block_rows, cols), lambda i: (i, 0)),
        ),
        compiler_params=pltpu.CompilerParams(
            # Independent row blocks -> shardable across v7x's 2 TensorCores;
            # no-op on single-TC v5e/v6e.
            dimension_semantics=("parallel",),
            # Headroom for double-buffered in+out blocks on every generation
            # (above v5e's 16 MiB default scoped limit, within v7x's 64 MiB).
            vmem_limit_bytes=32 * 1024 * 1024,
        ),
    )(w2d)
    return out2d.reshape(orig_shape)


def init_feature_grid(key, shape, init_scale):
    """Stand-in for torch.nn.init.uniform_(weight, -init_scale, init_scale)."""
    # TODO(synk): parameter registration / autograd bookkeeping is framework
    # state, not a kernel op; only init + forward materialization are done here.
    return jax.random.uniform(
        key, shape, dtype=jnp.float32, minval=-init_scale, maxval=init_scale
    )


if __name__ == "__main__":
    shape = (4, 16, 128)   # small, tile-friendly grid: 8192 f32 elements
    init_scale = 0.1

    key = jax.random.PRNGKey(0)
    weight = init_feature_grid(key, shape, init_scale)

    # Fast path: forward() is the identity -> hand back the parameter as-is.
    out_fast = feature_grid_forward(weight)
    assert out_fast is weight

    # Kernel path: lane-dense, multi-row-block Pallas copy into a fresh buffer.
    out = feature_grid_forward(weight, materialize=True)
    out = jax.block_until_ready(out)

    # Forward pass must return the stored weight exactly.
    assert out.shape == weight.shape and out.dtype == weight.dtype
    assert bool(jnp.all(out == weight))

    print("KERNEL_OK")
</pallas_src>

<mosaic_0001>
module attributes {stable_mosaic.version = 11 : i64} {
  func.func @_copy_kernel(%arg0: i32, %arg1: memref<8x512xf32, #tpu.memory_space<vmem>>, %arg2: memref<8x512xf32, #tpu.memory_space<vmem>>) attributes {dimension_semantics = [#tpu.dimension_semantics<parallel>], iteration_bounds = array<i64: 2>, scalar_prefetch = 0 : i64, scratch_operands = 0 : i64, tpu.core_type = #tpu.core_type<tc>, window_params = [{transform_indices = @transform_0, window_bounds = array<i64: 8, 512>}, {transform_indices = @transform_1, window_bounds = array<i64: 8, 512>}]} {
    %c0 = arith.constant 0 : index
    %c0_0 = arith.constant 0 : index
    %0 = vector.load %arg1[%c0, %c0_0] : memref<8x512xf32, #tpu.memory_space<vmem>>, vector<8x512xf32>
    %c0_1 = arith.constant 0 : index
    %c0_2 = arith.constant 0 : index
    %1 = vector.load %arg2[%c0_1, %c0_2] : memref<8x512xf32, #tpu.memory_space<vmem>>, vector<8x512xf32>
    tpu.vector_store %arg2[%c0_1, %c0_2], %0 {strides = array<i32>} : memref<8x512xf32, #tpu.memory_space<vmem>>, vector<8x512xf32>,
    return
  }
  func.func @transform_0(%arg0: i32) -> (i32, i32) {
    %c0_i32 = arith.constant 0 : i32
    %c0_i32_0 = arith.constant 0 : i32
    return %arg0, %c0_i32 : i32, i32
  }
  func.func @transform_1(%arg0: i32) -> (i32, i32) {
    %c0_i32 = arith.constant 0 : i32
    %c0_i32_0 = arith.constant 0 : i32
    return %arg0, %c0_i32 : i32, i32
  }
}

</mosaic_0001>

<bundles_post_ra>
// kernel: tpu_custom_call.1
= control target key start
LH: loop header
LB: loop body
LE: loop exit
PB: predicated region body
PF: predicated region fallthrough
CT: control target
= control target key end

     0   :  { %6 = vsyncpa [#allocation3], 0  ;;  %s547_s0 = inlined_call_operand.hbm [shape: f32[16,512], index: 0, kind: input, shape index: {}]   ;;  %s548_s1 = inlined_call_operand.hbm [shape: f32[16,512], index: 1, kind: output, shape index: {}]  }
   0x1   :  { %8 = vsyncpa [#allocation3 + $0x1], 0 }
   0x2   :  { %9 = vsyncpa [#allocation4], 0 }
   0x3   :  { %11 = vsyncpa [#allocation4 + $0x1], 0  ;;  %s394_s6 = smov 0   ;;  %s396_s7 = smov 0  }
   0x4   :  { %s398_s8 = smov 0   ;;  %s400_s9 = smov 0  }
   0x5 LB: > { %s415_s10 = sadd.s32 4294967295, %s380_s9   ;;  %s226_s11 = sadd.s32 4294967294, %s380_s9   ;;  %s380_s9 = sphi %s400_s9, %s565_s9   ;;  %s376_s8 = sphi %s398_s8, %s564_s8   ;;  %s372_s7 = sphi %s396_s7, %s563_s7   ;;  %s368_s6 = sphi %s394_s6, %s562_s6  }
   0x6   : > { %s419_s12 = sadd.s32 1, %s380_s9   ;;  %s24_s13 = sadd.s32 1, %s376_s8 }
   0x7   : > { %s21_s14 = ssub.s32 %s380_s9, %s419_s12  ;;  %p31_p0 = scmp.ne.s32.totalorder %s376_s8, %s372_s7 }
   0x8   : > { %p22_p1 = scmp.eq.s32.totalorder %s21_s14, 0  ;;  %p32_p2 = scmp.eq.s32.totalorder %s380_s9, 0 }
   0x9   : > { %p37_p3 = scmp.ne.s32.totalorder %s372_s7, %s368_s6  ;;  %p38_p4 = scmp.eq.s32.totalorder %s415_s10, 0 }
   0xa   : > { %s431_s15 = scalar_select %p22_p1, %s376_s8, %s24_s13  }
   0xb   : > { %p433_p5 = por %p32_p2, %p31_p0  ;;  %p437_p6 = por %p38_p4, %p37_p3 }
   0xc   : > { %p61_p7 = scmp.eq.s32.totalorder %s415_s10, 1  ;;  %p67_p8 = scmp.eq.s32.totalorder %s226_s11, 1 }
   0xd   : > { %s552_s17 = scalar_select %p437_p6, 1, 0 }
   0xe   : > { %p254_p10 = scmp.lt.s32.totalorder %s380_s9, 2  ;;  %p444_p11 = por %p61_p7, %p31_p0 }
   0xf   : > { %p448_p12 = por %p67_p8, %p37_p3  ;;  %s87_s20 = sand.u32 1, %s376_s8  }
  0x10   : > { %s553_s18 = scalar_select %p444_p11, 1, 0 }
  0x11   : > { %s554_s19 = scalar_select %p448_p12, 1, 0 }
  0x12   : > { %s240_s21 = sshll.u32 %s380_s9, 9  ;;  %s229_s22 = sshll.u32 %s87_s20, 5 }
  0x13   : > { %s457_s25 = scalar_lea.hbm %s547_s0, %s240_s21  ;;  %s91_s26 = scalar_lea.vmem [#allocation2], %s229_s22 }
  0x14   : > { %s99_s27 = sshll.u32 %s91_s26, 4  ;;  %p461_p13 = pnand %p254_p10, %p433_p5  ;;  %s465_s27 = int_to_ptr.vmem [resolvable:$true] %s99_s27 }
  0x15   : > { %s88_s29 = scalar_lea.sflag [#allocation3], %s87_s20  ;;  %s288_s30 = scalar_lea.hbm %s457_s25, 512 }
  0x16   : > { %p289_p2 = scmp.ne.s32.totalorder %s457_s25, %s288_s30  ;;  %p290_p3 = pneg %p461_p13 }
  0x17   : > { %s293_s4 = scalar_lea.hbm %s547_s0, 1024  ;;  %p294_p5 = scmp.lt.s32.totalorder %s457_s25, %s547_s0 }
  0x18   : > { %p291_p4 = pnand %p290_p3, %p289_p2  ;;  %p295_p8 = scmp.lt.s32.totalorder %s293_s4, %s288_s30 }
  0x1a   : > { %p292_p7 = pneg %p291_p4  ;;  %p296_p10 = por %p295_p8, %p294_p5 }
  0x1c   : > { %p297_p9 = pnand %p296_p10, %p292_p7 }
  0x1e   : > { %300 = shalt.err (!%p297_p9)
}
  0x1f   : > { %s301_s13 = scalar_lea.vmem %s465_s27, 512  ;;  %s382_s14 = smov [#allocation2]  }
  0x20   : > { %p302_p0 = scmp.ne.s32.totalorder %s465_s27, %s301_s13  ;;  %s306_s16 = sshll.u32 %s382_s14, 4  ;;  %s307_s16 = int_to_ptr.vmem [resolvable:$false] %s306_s16 }
  0x21   : > { %s308_s20 = scalar_lea.vmem %s307_s16, 1024  ;;  %p309_p4 = scmp.lt.s32.totalorder %s465_s27, %s307_s16 }
  0x22   : > { %p304_p1 = pnand %p302_p0, %p290_p3  ;;  %p310_p12 = scmp.lt.s32.totalorder %s308_s20, %s301_s13 }
  0x24   : > { %p305_p2 = pneg %p304_p1  ;;  %p311_p11 = por %p310_p12, %p309_p4 }
  0x26   : > { %p312_p6 = pnand %p311_p11, %p305_p2 }
  0x28   : > { %315 = shalt.err (!%p312_p6)
}
  0x29   : > { %249 = dma.hbm_to_vmem [thread:$0]  (!%p461_p13), %s457_s25, 512, %s465_s27, %s88_s29  }
  0x2a   : > { %p556_p9 = scmp.lt.s32.totalorder %s380_s9, 3  ;;  %p557_p7 = scmp.ge.s32.totalorder %s380_s9, 1 }
  0x2c   : > { %p105_p0 = pnand %p557_p7, %p556_p9 }
  0x2d   : > { %s492_s21 = sand.u32 (!%p105_p0), 1, %s372_s7   ;;  %p558_p6 = scmp.ne.s32.totalorder (!%p105_p0), %s552_s17, 0 }
  0x2e   : > { %108 = sbr.rel (%p105_p0) target bundleno = 77 (0x4d), region = 24  ;;  %s233_s22 = sshll.u32 (!%p105_p0), %s492_s21, 5 }
  0x2f   : > { %s111_s23 = scalar_lea.sflag (!%p105_p0), [#allocation3], %s492_s21  ;;  %s114_s24 = scalar_lea.vmem (!%p105_p0), [#allocation2], %s233_s22 }
  0x33   : > { %359 = dma.done.wait (%p558_p6), %s111_s23, 512  }
  0x34   : > { %361 = vsyncadd (%p558_p6), %s111_s23, 4294966784  ;;  %s132_s25 = scalar_lea.vmem [#allocation5], %s233_s22  ;;  %s241_s27 = sshll.u32 %s415_s10, 9  ;;  %v133_v0 = vld [vmem:[%s114_s24] sm:$0xff]  ;;  %v134_v1 = vld [vmem:[%s114_s24 + $0x8] sm:$0xff] }
  0x35   : > { %s156_s26 = sshll.u32 %s132_s25, 4  ;;  %v135_v2 = vld [vmem:[%s114_s24 + $0x10] sm:$0xff]  ;;  %s506_s30 = scalar_lea.hbm %s548_s1, %s241_s27  ;;  %137 = vst [vmem:[%s132_s25] sm:$0xff] %v133_v0  ;;  %138 = vst [vmem:[%s132_s25 + $0x8] sm:$0xff] %v134_v1  ;;  %v136_v3 = vld [vmem:[%s114_s24 + $0x18] sm:$0xff]  ;;  %s501_s26 = int_to_ptr.vmem [resolvable:$true] %s156_s26 }
  0x36   : > { %139 = vst [vmem:[%s132_s25 + $0x10] sm:$0xff] %v135_v2  ;;  %140 = vst [vmem:[%s132_s25 + $0x18] sm:$0xff] %v136_v3  ;;  %s142_s17 = scalar_lea.sflag [#allocation4], %s492_s21  ;;  %s316_s10 = scalar_lea.vmem %s501_s26, 512 }
  0x37   : > { %p317_p11 = scmp.ne.s32.totalorder %s501_s26, %s316_s10  ;;  %p559_p12 = scmp.ne.s32.totalorder %s553_s18, 0 }
  0x38   : > { %s383_s2 = smov [#allocation5]  }
  0x39   : > { %p318_p13 = pnand %p317_p11, %p559_p12  ;;  %s320_s3 = sshll.u32 %s383_s2, 4  ;;  %s321_s3 = int_to_ptr.vmem [resolvable:$false] %s320_s3 }
  0x3a   : > { %s322_s4 = scalar_lea.vmem %s321_s3, 1024  ;;  %p323_p3 = scmp.lt.s32.totalorder %s501_s26, %s321_s3 }
  0x3b   : > { %p319_p1 = pneg %p318_p13  ;;  %p324_p5 = scmp.lt.s32.totalorder %s322_s4, %s316_s10 }
  0x3d   : > { %p325_p8 = por %p324_p5, %p323_p3 }
  0x3f   : > { %p326_p10 = pnand %p325_p8, %p319_p1 }
  0x41   : > { %329 = shalt.err (!%p326_p10)
}
  0x42   : > { %s330_s5 = scalar_lea.hbm %s506_s30, 512  ;;  %s334_s14 = scalar_lea.hbm %s548_s1, 1024 }
  0x43   : > { %p331_p2 = scmp.ne.s32.totalorder %s506_s30, %s330_s5  ;;  %p335_p7 = scmp.lt.s32.totalorder %s506_s30, %s548_s1 }
  0x44   : > { %p336_p0 = scmp.lt.s32.totalorder %s334_s14, %s330_s5 }
  0x45   : > { %p332_p4 = pnand %p331_p2, %p559_p12 }
  0x46   : > { %p337_p6 = por %p336_p0, %p335_p7 }
  0x47   : > { %p333_p9 = pneg %p332_p4 }
  0x49   : > { %p338_p11 = pnand %p337_p6, %p333_p9 }
  0x4b   : > { %341 = shalt.err (!%p338_p11)
}
  0x4c   : > { %244 = dma.vmem_to_hbm [thread:$0]  (%p559_p12), %s501_s26, 512, %s506_s30, %s142_s17  }
  0x4d PF: > { %s168_s21 = sand.u32 1, %s368_s6   ;;  %p560_p13 = scmp.ne.s32.totalorder %s554_s19, 0 }
  0x4e   : > { %p561_p1 = scmp.ge.s32.totalorder %s380_s9, 2  ;;  %s169_s22 = scalar_lea.sflag [#allocation4], %s168_s21 }
  0x50   : > { %p251_p3 = pnand %p561_p1, %p560_p13 }
  0x52   : > { %p252_p5 = pneg %p251_p3 }
  0x54   : > { %363 = dma.done.wait (%p252_p5), %s169_s22, 512  }
  0x55   : > { %365 = vsyncadd (%p252_p5), %s169_s22, 4294966784  ;;  %p14_p8 = scmp.ge.s32.totalorder %s419_s12, 4   ;;  %s562_s6 = smov %s372_s7 }
  0x56   : > { %s563_s7 = smov %s376_s8  ;;  %s564_s8 = smov %s431_s15 }
  0x57   : > { %s565_s9 = smov %s419_s12  ;;  %16 = sbr.rel (!%p14_p8) target bundleno = 5 (0x5), region = 69 }
  0x5c   :  { %174 = vsyncpa [#allocation3], 1 }
  0x5d   :  { %176 = vsyncpa [#allocation3 + $0x1], 1 }
  0x5e   :  { %177 = vsyncpa [#allocation4], 1 }
  0x5f   :  { %179 = vsyncpa [#allocation4 + $0x1], 1 }

</bundles_post_ra>
